<compile_context>
chip_gen: v5e
topology: v5e:2x2
jax: 0.10.0
libtpu: 0.0.40
codegen_flags: <defaults>
</compile_context>

<pallas_src>
import functools

import jax
import jax.numpy as jnp
from jax.experimental import pallas as pl
from jax.experimental.pallas import tpu as pltpu

LANES = 128
SUBLANES = 8
BLOCK_ROWS = 4096     # (4096, 128) f32 tile = 2 MiB
NCORES = 2            # leading "parallel" grid axis; shards across TCs on v7x


def _round_up(x, m):
    return (x + m - 1) // m * m


def _focal_elementwise(x, t, *, alpha, gamma, logits, binary_targets):
    """Per-element focal loss (forward semantics of the PyTorch module)."""
    x = x.astype(jnp.float32)
    t = t.astype(jnp.float32)
    if logits:
        # F.binary_cross_entropy_with_logits, numerically stable form.
        # (explicit log(1+exp(-|x|)) instead of log1p for lowering safety)
        bce = jnp.maximum(x, 0.0) - x * t + jnp.log(1.0 + jnp.exp(-jnp.abs(x)))
    else:
        # F.binary_cross_entropy: PyTorch clamps log at -100.
        log_p = jnp.maximum(jnp.log(x), -100.0)
        log_1mp = jnp.maximum(jnp.log(1.0 - x), -100.0)
        bce = -(t * log_p + (1.0 - t) * log_1mp)
    if binary_targets and not logits:
        # For 0/1 targets exp(-bce) == t*x + (1-t)*(1-x): saves one EUP exp
        # per element (matters on v7x where EUP, not HBM, binds).
        pt = t * x + (1.0 - t) * (1.0 - x)
    else:
        pt = jnp.exp(-bce)
    one_m_pt = 1.0 - pt
    g = float(gamma)
    if g.is_integer() and 0 <= g <= 8:
        gi = int(g)
        mod = jnp.ones_like(one_m_pt) if gi == 0 else one_m_pt
        for _ in range(max(gi - 1, 0)):
            mod = mod * one_m_pt
    else:
        mod = one_m_pt ** g
    return (alpha * mod) * bce


def _focal_sum_kernel(x_ref, t_ref, out_ref, *, alpha, gamma, logits,
                      binary_targets, n_valid, block_rows, blocks_per_core,
                      n_full_blocks, needs_mask):
    c = pl.program_id(0)               # core slab
    j = pl.program_id(1)               # block within slab (reduction axis)
    g = c * blocks_per_core + j        # unclamped global block index

    @pl.when(j == 0)
    def _():
        out_ref[...] = jnp.zeros_like(out_ref)

    f = _focal_elementwise(x_ref[...], t_ref[...], alpha=alpha, gamma=gamma,
                           logits=logits, binary_targets=binary_targets)

    def _accum(vals):
        # (block_rows,128) -> (block_rows//8, 8, 128): vreg-wise VPU adds only;
        # the sublane+lane reduce is deferred to the wrapper.
        out_ref[...] += jnp.sum(vals.reshape(-1, SUBLANES, LANES), axis=0)

    if not needs_mask:
        _accum(f)
    else:
        @pl.when(g < n_full_blocks)     # fully-valid blocks: no masking
        def _():
            _accum(f)

        @pl.when(g >= n_full_blocks)    # tail / grid-overhang blocks
        def _():
            row = (jax.lax.broadcasted_iota(jnp.int32, f.shape, 0)
                   + g * block_rows)
            lane = jax.lax.broadcasted_iota(jnp.int32, f.shape, 1)
            n_full_rows = n_valid // LANES
            rem = n_valid % LANES
            valid = (row < n_full_rows) | ((row == n_full_rows) & (lane < rem))
            _accum(jnp.where(valid, f, 0.0))


def focal_loss(inputs, targets, *, alpha=1.0, gamma=2.0, logits=False,
               binary_targets=False):
    """Mean focal loss over all elements (reduce=True path of the module)."""
    # TODO(synk): reduce=False (per-element output) path not exposed; the
    # default module config uses reduce=True.
    n_valid = int(inputs.size)
    x = inputs.reshape(-1)
    t = targets.reshape(-1)

    # Lane/sublane alignment only (multiple of 8*128 = 1024 elements).  This
    # copies the inputs only for ragged sizes, and pads <= 1023 elements; the
    # pad values are masked out in-kernel, so any finite value works.
    n_aligned = _round_up(max(n_valid, 1), SUBLANES * LANES)
    if n_aligned != n_valid:
        pad = n_aligned - n_valid
        x = jnp.concatenate([x, jnp.full((pad,), 0.5, x.dtype)])
        t = jnp.concatenate([t, jnp.full((pad,), 0.5, t.dtype)])

    rows = n_aligned // LANES                    # multiple of 8
    x2 = x.reshape(rows, LANES)
    t2 = t.reshape(rows, LANES)

    block_rows = min(BLOCK_ROWS, rows)           # multiple of 8, <= rows
    n_blocks = pl.cdiv(rows, block_rows)
    ncores = NCORES if n_blocks >= NCORES else 1
    blocks_per_core = pl.cdiv(n_blocks, ncores)
    n_grid_blocks = ncores * blocks_per_core
    # Blocks whose every element index is < n_valid need no masking.
    n_full_blocks = n_valid // (block_rows * LANES)
    needs_mask = n_full_blocks < n_grid_blocks
    last_block = n_blocks - 1

    def in_map(c, j):
        # Clamp grid-overhang blocks (g >= n_blocks) to the last real block;
        # their contribution is zeroed by the in-kernel mask.
        return (jnp.minimum(c * blocks_per_core + j, last_block), 0)

    kernel = functools.partial(
        _focal_sum_kernel, alpha=float(alpha), gamma=float(gamma),
        logits=bool(logits), binary_targets=bool(binary_targets),
        n_valid=n_valid, block_rows=block_rows,
        blocks_per_core=blocks_per_core, n_full_blocks=n_full_blocks,
        needs_mask=needs_mask)

    partials = pl.pallas_call(
        kernel,
        out_shape=jax.ShapeDtypeStruct((ncores * SUBLANES, LANES), jnp.float32),
        grid_spec=pltpu.PrefetchScalarGridSpec(
            num_scalar_prefetch=0,
            grid=(ncores, blocks_per_core),
            in_specs=[
                pl.BlockSpec((block_rows, LANES), in_map),
                pl.BlockSpec((block_rows, LANES), in_map),
            ],
            out_specs=pl.BlockSpec((SUBLANES, LANES), lambda c, j: (c, 0)),
        ),
        compiler_params=pltpu.CompilerParams(
            dimension_semantics=("parallel", "arbitrary"),
            # 2 inputs x 2 pipeline buffers x 2 MiB = 8 MiB plus block-wide
            # elementwise temporaries (~10 MiB worst case): give headroom, but
            # stay well under v7x's 64 MiB physical VMEM.
            vmem_limit_bytes=48 * 1024 * 1024,
        ),
    )(x2, t2)

    # Final sublane+lane reduce and mean in the wrapper (cheap; keeps the
    # kernel's store a plain unmasked vreg write instead of a padded (1,1)).
    return jnp.sum(partials) / jnp.float32(n_valid)


def focal_loss_ref(inputs, targets, *, alpha=1.0, gamma=2.0, logits=False):
    x = inputs.astype(jnp.float32)
    t = targets.astype(jnp.float32)
    if logits:
        bce = jnp.maximum(x, 0.0) - x * t + jnp.log1p(jnp.exp(-jnp.abs(x)))
    else:
        bce = -(t * jnp.maximum(jnp.log(x), -100.0)
                + (1.0 - t) * jnp.maximum(jnp.log(1.0 - x), -100.0))
    pt = jnp.exp(-bce)
    return jnp.mean(alpha * (1.0 - pt) ** gamma * bce)


if __name__ == "__main__":
    key = jax.random.PRNGKey(0)
    ks = jax.random.split(key, 8)

    # 1) Module-default config (logits=False) at the spec shape (2, 4, 16, 16):
    #    inputs are probabilities, targets are 0/1 labels.
    x = jax.random.uniform(ks[0], (2, 4, 16, 16), jnp.float32,
                           minval=0.01, maxval=0.99)
    t = (jax.random.uniform(ks[1], (2, 4, 16, 16), jnp.float32) > 0.5
         ).astype(jnp.float32)
    out = jax.block_until_ready(focal_loss(x, t))
    ref = focal_loss_ref(x, t)
    assert jnp.allclose(out, ref, rtol=1e-5, atol=1e-6), (out, ref)

    # Binary-target fast path (drops the exp(-bce) EUP op) on the same data.
    out_b = jax.block_until_ready(focal_loss(x, t, binary_targets=True))
    assert jnp.allclose(out_b, ref, rtol=1e-4, atol=1e-6), (out_b, ref)

    # logits=True config of the module.
    xl = jax.random.normal(ks[2], (2, 4, 16, 16), jnp.float32)
    out_l = jax.block_until_ready(focal_loss(xl, t, logits=True))
    ref_l = focal_loss_ref(xl, t, logits=True)
    assert jnp.allclose(out_l, ref_l, rtol=1e-5, atol=1e-6), (out_l, ref_l)

    # 2) Ragged element count (not a multiple of 128): exercises the tiny
    #    alignment pad plus the in-kernel tail mask.
    xr = jax.random.uniform(ks[3], (3, 5, 17, 13), jnp.float32,
                            minval=0.01, maxval=0.99)
    tr = (jax.random.uniform(ks[4], (3, 5, 17, 13), jnp.float32) > 0.5
          ).astype(jnp.float32)
    out_r = jax.block_until_ready(focal_loss(xr, tr))
    ref_r = focal_loss_ref(xr, tr)
    assert jnp.allclose(out_r, ref_r, rtol=1e-5, atol=1e-6), (out_r, ref_r)

    # 3) Multi-block tiled path: 5 blocks of 4096 rows split over the size-2
    #    "parallel" core axis (core 1 gets one grid-overhang block, masked).
    xb = jax.random.uniform(ks[5], (16, 8, 128, 160), jnp.float32,
                            minval=0.01, maxval=0.99)
    tb = (jax.random.uniform(ks[6], (16, 8, 128, 160), jnp.float32) > 0.5
          ).astype(jnp.float32)
    out_big = jax.block_until_ready(focal_loss(xb, tb))
    ref_big = focal_loss_ref(xb, tb)
    assert jnp.allclose(out_big, ref_big, rtol=1e-4, atol=1e-6), (out_big, ref_big)

    print("KERNEL_OK")
</pallas_src>

<mosaic_0001>
module attributes {stable_mosaic.version = 11 : i64} {
  func.func @_focal_sum_kernel(%arg0: i32, %arg1: i32, %arg2: memref<16x128xf32, #tpu.memory_space<vmem>>, %arg3: memref<16x128xf32, #tpu.memory_space<vmem>>, %arg4: memref<8x128xf32, #tpu.memory_space<vmem>>) attributes {dimension_semantics = [#tpu.dimension_semantics<parallel>, #tpu.dimension_semantics<arbitrary>], iteration_bounds = array<i64: 1, 1>, scalar_prefetch = 0 : i64, scratch_operands = 0 : i64, tpu.core_type = #tpu.core_type<tc>, window_params = [{transform_indices = @transform_0, window_bounds = array<i64: 16, 128>}, {transform_indices = @transform_1, window_bounds = array<i64: 16, 128>}, {transform_indices = @transform_2, window_bounds = array<i64: 8, 128>}]} {
    %c0_i32 = arith.constant 0 : i32
    %0 = arith.cmpi eq, %arg1, %c0_i32 : i32
    %1 = arith.extui %0 : i1 to i32
    %c0_i32_0 = arith.constant 0 : i32
    %2 = arith.cmpi ne, %1, %c0_i32_0 : i32
    scf.if %2 {
      %cst_16 = arith.constant 0.000000e+00 : f32
      %34 = vector.broadcast %cst_16 : f32 to vector<8x128xf32>
      %c0_17 = arith.constant 0 : index
      %c0_18 = arith.constant 0 : index
      %35 = vector.load %arg4[%c0_17, %c0_18] : memref<8x128xf32, #tpu.memory_space<vmem>>, vector<8x128xf32>
      tpu.vector_store %arg4[%c0_17, %c0_18], %34 {strides = array<i32>} : memref<8x128xf32, #tpu.memory_space<vmem>>, vector<8x128xf32>,
    } else {
    }
    %c0 = arith.constant 0 : index
    %c0_1 = arith.constant 0 : index
    %3 = vector.load %arg2[%c0, %c0_1] : memref<16x128xf32, #tpu.memory_space<vmem>>, vector<16x128xf32>
    %c0_2 = arith.constant 0 : index
    %c0_3 = arith.constant 0 : index
    %4 = vector.load %arg3[%c0_2, %c0_3] : memref<16x128xf32, #tpu.memory_space<vmem>>, vector<16x128xf32>
    %5 = math.log %3 : vector<16x128xf32>
    %cst = arith.constant -1.000000e+02 : f32
    %6 = vector.broadcast %cst : f32 to vector<16x128xf32>
    %7 = arith.maximumf %5, %6 : vector<16x128xf32>
    %cst_4 = arith.constant 1.000000e+00 : f32
    %8 = vector.broadcast %cst_4 : f32 to vector<16x128xf32>
    %9 = arith.subf %8, %3 : vector<16x128xf32>
    %10 = math.log %9 : vector<16x128xf32>
    %cst_5 = arith.constant -1.000000e+02 : f32
    %11 = vector.broadcast %cst_5 : f32 to vector<16x128xf32>
    %12 = arith.maximumf %10, %11 : vector<16x128xf32>
    %13 = arith.mulf %4, %7 : vector<16x128xf32>
    %cst_6 = arith.constant 1.000000e+00 : f32
    %14 = vector.broadcast %cst_6 : f32 to vector<16x128xf32>
    %15 = arith.subf %14, %4 : vector<16x128xf32>
    %16 = arith.mulf %15, %12 : vector<16x128xf32>
    %17 = arith.addf %13, %16 : vector<16x128xf32>
    %cst_7 = arith.constant 0.000000e+00 : f32
    %18 = vector.broadcast %cst_7 : f32 to vector<16x128xf32>
    %19 = arith.subf %18, %17 : vector<16x128xf32>
    %cst_8 = arith.constant 0.000000e+00 : f32
    %20 = vector.broadcast %cst_8 : f32 to vector<16x128xf32>
    %21 = arith.subf %20, %19 : vector<16x128xf32>
    %22 = math.exp %21 : vector<16x128xf32>
    %cst_9 = arith.constant 1.000000e+00 : f32
    %23 = vector.broadcast %cst_9 : f32 to vector<16x128xf32>
    %24 = arith.subf %23, %22 : vector<16x128xf32>
    %25 = arith.mulf %24, %24 : vector<16x128xf32>
    %cst_10 = arith.constant 1.000000e+00 : f32
    %26 = vector.broadcast %cst_10 : f32 to vector<16x128xf32>
    %27 = arith.mulf %26, %25 : vector<16x128xf32>
    %28 = arith.mulf %27, %19 : vector<16x128xf32>
    %c0_11 = arith.constant 0 : index
    %c0_12 = arith.constant 0 : index
    %29 = vector.load %arg4[%c0_11, %c0_12] : memref<8x128xf32, #tpu.memory_space<vmem>>, vector<8x128xf32>
    %30 = vector.shape_cast %28 : vector<16x128xf32> to vector<2x8x128xf32>
    %cst_13 = arith.constant dense<0.000000e+00> : vector<8x128xf32>
    %31 = vector.multi_reduction <add>, %30, %cst_13 [0] : vector<2x8x128xf32> to vector<8x128xf32>
    %32 = arith.addf %29, %31 : vector<8x128xf32>
    %c0_14 = arith.constant 0 : index
    %c0_15 = arith.constant 0 : index
    %33 = vector.load %arg4[%c0_14, %c0_15] : memref<8x128xf32, #tpu.memory_space<vmem>>, vector<8x128xf32>
    tpu.vector_store %arg4[%c0_14, %c0_15], %32 {strides = array<i32>} : memref<8x128xf32, #tpu.memory_space<vmem>>, vector<8x128xf32>,
    return
  }
  func.func @transform_0(%arg0: i32, %arg1: i32) -> (i32, i32) {
    %c1_i32 = arith.constant 1 : i32
    %0 = arith.muli %arg0, %c1_i32 : i32
    %1 = arith.addi %0, %arg1 : i32
    %c0_i32 = arith.constant 0 : i32
    %2 = arith.minsi %1, %c0_i32 : i32
    %c0_i32_0 = arith.constant 0 : i32
    %c0_i32_1 = arith.constant 0 : i32
    return %2, %c0_i32_0 : i32, i32
  }
  func.func @transform_1(%arg0: i32, %arg1: i32) -> (i32, i32) {
    %c1_i32 = arith.constant 1 : i32
    %0 = arith.muli %arg0, %c1_i32 : i32
    %1 = arith.addi %0, %arg1 : i32
    %c0_i32 = arith.constant 0 : i32
    %2 = arith.minsi %1, %c0_i32 : i32
    %c0_i32_0 = arith.constant 0 : i32
    %c0_i32_1 = arith.constant 0 : i32
    return %2, %c0_i32_0 : i32, i32
  }
  func.func @transform_2(%arg0: i32, %arg1: i32) -> (i32, i32) {
    %c0_i32 = arith.constant 0 : i32
    %c0_i32_0 = arith.constant 0 : i32
    return %arg0, %c0_i32 : i32, i32
  }
}

</mosaic_0001>

<bundles_post_ra>
// kernel: tpu_custom_call.1
= control target key start
LH: loop header
LB: loop body
LE: loop exit
PB: predicated region body
PF: predicated region fallthrough
CT: control target
= control target key end

     0   :  { %7 = vsyncpa [#allocation3], 0  ;;  %s260_s0 = inlined_call_operand.hbm [shape: f32[16,128], index: 0, kind: input, shape index: {}]   ;;  %s261_s1 = inlined_call_operand.hbm [shape: f32[16,128], index: 1, kind: input, shape index: {}]   ;;  %s262_s2 = inlined_call_operand.hbm [shape: f32[8,128], index: 2, kind: output, shape index: {}]  }
   0x1   :  { %8 = vsyncpa [#allocation6], 0 }
   0x2   :  { %9 = vsyncpa [#allocation4], 0  ;;  %s20_s11 = sshll.u32 %s260_s0, 4  ;;  %s231_s12 = smov [#allocation2]   ;;  %s21_s11 = int_to_ptr.hbm [resolvable:$true] %s20_s11 }
   0x3   :  { %s22_s13 = sshll.u32 %s231_s12, 4  ;;  %s39_s16 = sshll.u32 %s261_s1, 4  ;;  %s23_s13 = int_to_ptr.vmem [resolvable:$true] %s22_s13  ;;  %s40_s16 = int_to_ptr.hbm [resolvable:$true] %s39_s16 }
   0x4   :  { %s232_s17 = smov 128   ;;  %s233_s18 = smov 8  }
   0x5   :  { %28 = dma.hbm_to_vmem [thread:$0]  %s21_s11, 256, %s23_s13, [#allocation3], %s232_s17, %s232_s17, %s233_s18  }
   0x6   :  { %s234_s19 = smov [#allocation5]  }
   0x7   :  { %s41_s20 = sshll.u32 %s234_s19, 4  ;;  %s42_s20 = int_to_ptr.vmem [resolvable:$true] %s41_s20 }
   0x8   :  { %47 = dma.hbm_to_vmem [thread:$0]  %s40_s16, 256, %s42_s20, [#allocation6], %s232_s17, %s232_s17, %s233_s18  }
   0x9   :  { %225 = dma.done.wait [#allocation3], 256  }
   0xa   :  { %226 = vsyncadd [#allocation3], 4294967040 }
   0xb   :  { %227 = dma.done.wait [#allocation6], 256  }
   0xc   :  { %228 = vsyncadd [#allocation6], 4294967040  ;;  %v69_v0 = vld [vmem:[#allocation2] sm:$0xff]  ;;  %v70_v1 = vld [vmem:[#allocation2 + $0x8] sm:$0xff]  ;;  %s235_s0 = smov [#allocation7]   ;;  %s120_s23 = sshll.u32 %s262_s2, 4  ;;  %s121_s23 = int_to_ptr.hbm [resolvable:$true] %s120_s23 }
   0xd   :  { %141 = vlog2.f32 %v69_v0  ;;  %v79_v2 = vsub.f32 1.0, %v69_v0  ;;  %v80_v3 = vsub.f32 1.0, %v70_v1  ;;  %v71_v5 = vld [vmem:[#allocation5] sm:$0xff]  ;;  %v72_v7 = vld [vmem:[#allocation5 + $0x8] sm:$0xff]  ;;  %s118_s1 = sshll.u32 %s235_s0, 4  ;;  %s119_s1 = int_to_ptr.vmem [resolvable:$true] %s118_s1 }
   0xe   :  { %143 = vlog2.f32 %v70_v1  ;;  %v89_v14 = vsub.f32 1.0, %v71_v5  ;;  %v90_v17 = vsub.f32 1.0, %v72_v7 }
   0xf   :  { %145 = vlog2.f32 %v79_v2 }
  0x10   :  { %147 = vlog2.f32 %v80_v3 }
  0x13   :  { %v142_v4 = vpop.eup %141 }
  0x14   :  { %v144_v6 = vpop.eup %143  ;;  %v74_v8 = vmul.f32 0.6931472, %v142_v4 }
  0x15   :  { %v146_v9 = vpop.eup %145  ;;  %v76_v10 = vmul.f32 0.6931472, %v144_v6 }
  0x16   :  { %v148_v11 = vpop.eup %147  ;;  %v77_v12 = vmax.f32 %v74_v8, -100.0  ;;  %v82_v13 = vmul.f32 0.6931472, %v146_v9 }
  0x17   :  { %v78_v15 = vmax.f32 %v76_v10, -100.0  ;;  %v84_v16 = vmul.f32 0.6931472, %v148_v11 }
  0x18   :  { %v85_v18 = vmax.f32 %v82_v13, -100.0  ;;  %v87_v19 = vmul.f32 %v77_v12, %v71_v5 }
  0x19   :  { %v86_v20 = vmax.f32 %v84_v16, -100.0  ;;  %v88_v21 = vmul.f32 %v78_v15, %v72_v7 }
  0x1a   :  { %v91_v22 = vmul.f32 %v89_v14, %v85_v18 }
  0x1b   :  { %v92_v23 = vmul.f32 %v90_v17, %v86_v20 }
  0x1c   :  { %v93_v24 = vadd.f32 %v91_v22, %v87_v19 }
  0x1d   :  { %v94_v25 = vadd.f32 %v92_v23, %v88_v21 }
  0x1e   :  { %v95_v26 = vsub.f32 0.0, %v93_v24 }
  0x1f   :  { %v96_v27 = vsub.f32 0.0, %v94_v25 }
  0x20   :  { %v97_v28 = vsub.f32 0.0, %v95_v26 }
  0x21   :  { %v98_v29 = vsub.f32 0.0, %v96_v27 }
  0x22   :  { %v99_v30 = vmul.f32 1.442695, %v97_v28 }
  0x23   :  { %v101_v31 = vmul.f32 1.442695, %v98_v29 }
  0x24   :  { %149 = vpow2.f32 %v99_v30 }
  0x25   :  { %151 = vpow2.f32 %v101_v31 }
  0x2a   :  { %v150_v32 = vpop.eup %149 }
  0x2b   :  { %v152_v33 = vpop.eup %151  ;;  %v103_v34 = vsub.f32 1.0, %v150_v32 }
  0x2c   :  { %v104_v35 = vsub.f32 1.0, %v152_v33 }
  0x2d   :  { %v105_v36 = vmul.f32 %v103_v34, %v103_v34 }
  0x2e   :  { %v106_v37 = vmul.f32 %v104_v35, %v104_v35 }
  0x2f   :  { %v107_v38 = vmul.f32 %v105_v36, %v95_v26 }
  0x30   :  { %v108_v39 = vmul.f32 %v106_v37, %v96_v27 }
  0x32   :  { %v110_v40 = vadd.f32 %v108_v39, %v107_v38 }
  0x34   :  { %112 = vst [vmem:[#allocation7] sm:$0xff] %v110_v40 }
  0x35   :  { %123 = dma.vmem_to_hbm [thread:$0]  %s119_s1, 128, %s121_s23, [#allocation4]  }
  0x36   :  { %229 = dma.done.wait [#allocation4], 128  }
  0x37   :  { %230 = vsyncadd [#allocation4], 4294967168 }
  0x38   :  { %128 = vsyncpa [#allocation3], 1 }
  0x39   :  { %129 = vsyncpa [#allocation6], 1 }
  0x3a   :  { %130 = vsyncpa [#allocation4], 1 }

</bundles_post_ra>
